<compile_context>
chip_gen: v7x
topology: tpu7x:2x2x1
jax: 0.10.0
libtpu: 0.0.40
codegen_flags: <defaults>
</compile_context>

<pallas_src>
import math

import jax
import jax.numpy as jnp
from jax.experimental import pallas as pl
from jax.experimental.pallas import tpu as pltpu

# ---------------- problem sizes (small, consistent with the module) ----------
B = 2            # batch
S = 8            # sequence length
H = 32           # hidden_dim
NUM_HEADS = 4
HEAD_DIM = H // NUM_HEADS
MLP = 64         # mlp_dim
EPS = 1e-6       # LayerNorm eps (partial(nn.LayerNorm, eps=1e-06))
BS = B * S       # flattened token count

W_ROWS = 3 * H + MLP   # rows in the packed weight blob  (160)
C_ROWS = 8 + BS        # rows in the packed constants blob (24)
LANES = 128            # blob lane width (keeps blobs (8,128)-aligned)


def _layernorm(v, g, b):
    # PyTorch LayerNorm: biased variance over last dim, eps inside sqrt.
    mu = jnp.mean(v, axis=-1, keepdims=True)
    var = jnp.mean((v - mu) ** 2, axis=-1, keepdims=True)
    return (v - mu) * jax.lax.rsqrt(var + EPS) * g + b


def _erf_approx(x):
    # Abramowitz & Stegun 7.1.26 rational approximation of erf, |err| <= 1.5e-7.
    # Used instead of lax.erf to guarantee a Mosaic lowering (exp/mul/add/where only).
    # TODO(synk): switch to jax.lax.erf if/when Mosaic exposes a direct lowering.
    a1, a2, a3, a4, a5 = 0.254829592, -0.284496736, 1.421413741, -1.453152027, 1.061405429
    p = 0.3275911
    sgn = jnp.where(x < 0.0, -1.0, 1.0)
    ax = jnp.abs(x)
    t = 1.0 / (1.0 + p * ax)
    poly = ((((a5 * t + a4) * t + a3) * t + a2) * t + a1) * t
    return sgn * (1.0 - poly * jnp.exp(-ax * ax))


def _gelu_exact(x):
    # torch.nn.GELU default (approximate='none'): 0.5*x*(1+erf(x/sqrt(2)))
    return 0.5 * x * (1.0 + _erf_approx(x * (1.0 / math.sqrt(2.0))))


def encoder_block_kernel(x_ref, w_ref, c_ref, out_ref):
    xf = x_ref[...]                                   # (BS, H) f32

    # --- static views into the two packed parameter blobs (3 DMAs total) ---
    ln1_g = c_ref[0:1, 0:H]
    ln1_b = c_ref[1:2, 0:H]
    bqkv  = c_ref[2:3, 0:3 * H]                       # Q part pre-scaled
    bo    = c_ref[3:4, 0:H]
    ln2_g = c_ref[4:5, 0:H]
    ln2_b = c_ref[5:6, 0:H]
    b1    = c_ref[6:7, 0:MLP]
    b2    = c_ref[7:8, 0:H]
    # Precomputed additive block-diagonal mask (0 same-image, -1e30 cross-image).
    # NOTE: every row has >= S unmasked keys, so softmax rows are never empty.
    mask  = c_ref[8:8 + BS, 0:BS]                     # (BS, BS)

    wqkv = w_ref[0:H, 0:3 * H]                        # (H, 3H)  [Wq*scale | Wk | Wv]^T
    wo   = w_ref[H:2 * H, 0:H]                        # (H, H)   Wout^T
    w1   = w_ref[2 * H:3 * H, 0:MLP]                  # (H, MLP) W1^T
    w2   = w_ref[3 * H:3 * H + MLP, 0:H]              # (MLP, H) W2^T

    # ---- ln_1 ----
    h1 = _layernorm(xf, ln1_g, ln1_b)

    # ---- fused QKV projection: ONE (BS,H)x(H,3H) MXU matmul, 96 output lanes ----
    qkv = jnp.dot(h1, wqkv, preferred_element_type=jnp.float32) + bqkv    # (BS, 3H)

    # ---- per-head attention via static lane slices (all matmuls stay 2-D) ----
    head_outs = []
    for hh in range(NUM_HEADS):
        lo, hi = hh * HEAD_DIM, (hh + 1) * HEAD_DIM
        qh = qkv[:, lo:hi]                            # (BS, HD)  already scaled
        kh = qkv[:, H + lo:H + hi]                    # (BS, HD)
        vh = qkv[:, 2 * H + lo:2 * H + hi]            # (BS, HD)
        sh = jnp.einsum("qd,kd->qk", qh, kh,
                        preferred_element_type=jnp.float32) + mask        # (BS, BS)
        mh = jnp.max(sh, axis=-1, keepdims=True)
        eh = jnp.exp(sh - mh)
        ph = eh / jnp.sum(eh, axis=-1, keepdims=True)  # exact softmax (no approx recip)
        head_outs.append(jnp.dot(ph, vh, preferred_element_type=jnp.float32))
    o = jnp.concatenate(head_outs, axis=-1)           # (BS, H), torch head-major order

    # ---- fused output projection: ONE (BS,H)x(H,H) matmul over all heads ----
    attn = jnp.dot(o, wo, preferred_element_type=jnp.float32) + bo

    x2 = attn + xf                                    # residual 1 (dropout = identity)

    # ---- ln_2 + MLP (Linear -> GELU -> Linear; dropouts are identity) ----
    h2 = _layernorm(x2, ln2_g, ln2_b)
    y = jnp.dot(h2, w1, preferred_element_type=jnp.float32) + b1
    y = _gelu_exact(y)
    y = jnp.dot(y, w2, preferred_element_type=jnp.float32) + b2

    out_ref[...] = (x2 + y).astype(out_ref.dtype)


def prepare_params(p):
    """Wrapper-side layout plumbing: PyTorch-layout params -> 2 packed blobs.

    w_blob (W_ROWS, 128): rows [0:H]      fused Wqkv^T (Q cols pre-scaled by 1/sqrt(HD))
                          rows [H:2H]     Wout^T
                          rows [2H:3H]    W1^T
                          rows [3H:3H+MLP] W2^T
    c_blob (C_ROWS, 128): rows 0..7 = ln1_g, ln1_b, bqkv(scaled Q), bo, ln2_g, ln2_b, b1, b2
                          rows 8..8+BS = additive block-diagonal attention mask (BS, BS)
    """
    scale = 1.0 / math.sqrt(HEAD_DIM)
    col_scale = jnp.concatenate(
        [jnp.full((H,), scale, jnp.float32), jnp.ones((2 * H,), jnp.float32)])
    wqkv_t = p["wqkv"].T * col_scale[None, :]          # (H, 3H), cols [q|k|v]
    bqkv = p["bqkv"].reshape(3 * H) * col_scale

    w_blob = jnp.zeros((W_ROWS, LANES), jnp.float32)
    w_blob = w_blob.at[0:H, 0:3 * H].set(wqkv_t)
    w_blob = w_blob.at[H:2 * H, 0:H].set(p["wout"].T)
    w_blob = w_blob.at[2 * H:3 * H, 0:MLP].set(p["w1"].T)
    w_blob = w_blob.at[3 * H:3 * H + MLP, 0:H].set(p["w2"].T)

    c_blob = jnp.zeros((C_ROWS, LANES), jnp.float32)
    c_blob = c_blob.at[0, 0:H].set(p["ln1_g"].reshape(H))
    c_blob = c_blob.at[1, 0:H].set(p["ln1_b"].reshape(H))
    c_blob = c_blob.at[2, 0:3 * H].set(bqkv)
    c_blob = c_blob.at[3, 0:H].set(p["bout"].reshape(H))
    c_blob = c_blob.at[4, 0:H].set(p["ln2_g"].reshape(H))
    c_blob = c_blob.at[5, 0:H].set(p["ln2_b"].reshape(H))
    c_blob = c_blob.at[6, 0:MLP].set(p["b1"].reshape(MLP))
    c_blob = c_blob.at[7, 0:H].set(p["b2"].reshape(H))

    tok_b = jnp.arange(BS) // S
    mask = jnp.where(tok_b[:, None] == tok_b[None, :], 0.0, -1e30).astype(jnp.float32)
    c_blob = c_blob.at[8:8 + BS, 0:BS].set(mask)

    return {"w": w_blob, "c": c_blob}


def encoder_block(x, kp):
    """x: (B, S, H) float32. kp: packed-blob params from prepare_params()."""
    assert x.shape == (B, S, H)
    xf = x.reshape(BS, H)   # wrapper-side flatten (free leading-dims reshape)
    vmem = lambda: pl.BlockSpec(memory_space=pltpu.MemorySpace.VMEM)
    out = pl.pallas_call(
        encoder_block_kernel,
        out_shape=jax.ShapeDtypeStruct((BS, H), x.dtype),
        in_specs=[vmem(), vmem(), vmem()],
        out_specs=vmem(),
    )(xf, kp["w"], kp["c"])
    return out.reshape(B, S, H)


def init_params(key):
    """Deterministic parameter init mimicking the module's __init__ (PyTorch layouts)."""
    ks = jax.random.split(key, 8)
    bound_attn = math.sqrt(3.0 / H)          # nn.init.uniform_(-bound, bound)
    bound_l1 = 1.0 / math.sqrt(H)            # nn.Linear default bound
    bound_l2 = 1.0 / math.sqrt(MLP)
    return {
        "ln1_g": jnp.ones((1, H), jnp.float32),
        "ln1_b": jnp.zeros((1, H), jnp.float32),
        "wqkv": jax.random.uniform(ks[0], (3 * H, H), jnp.float32, -bound_attn, bound_attn),
        "bqkv": jnp.zeros((1, 3 * H), jnp.float32),   # MHA in_proj_bias init is zeros
        "wout": jax.random.uniform(ks[1], (H, H), jnp.float32, -bound_attn, bound_attn),
        "bout": jnp.zeros((1, H), jnp.float32),       # out_proj bias init is zeros
        "ln2_g": jnp.ones((1, H), jnp.float32),
        "ln2_b": jnp.zeros((1, H), jnp.float32),
        "w1": jax.random.uniform(ks[2], (MLP, H), jnp.float32, -bound_l1, bound_l1),
        "b1": jax.random.uniform(ks[3], (1, MLP), jnp.float32, -bound_l1, bound_l1),
        "w2": jax.random.uniform(ks[4], (H, MLP), jnp.float32, -bound_l2, bound_l2),
        "b2": jax.random.uniform(ks[5], (1, H), jnp.float32, -bound_l2, bound_l2),
    }


def encoder_block_ref(x, p):
    """Pure-JAX reference (PyTorch semantics), high-precision matmuls."""
    hp = "highest"

    def ln(v, g, b):
        mu = v.mean(-1, keepdims=True)
        var = ((v - mu) ** 2).mean(-1, keepdims=True)
        return (v - mu) / jnp.sqrt(var + EPS) * g + b

    h = ln(x, p["ln1_g"], p["ln1_b"])
    qkv = jnp.dot(h, p["wqkv"].T, precision=hp) + p["bqkv"]
    q, k, v = jnp.split(qkv, 3, axis=-1)
    q = q.reshape(B, S, NUM_HEADS, HEAD_DIM).transpose(0, 2, 1, 3)
    k = k.reshape(B, S, NUM_HEADS, HEAD_DIM).transpose(0, 2, 1, 3)
    v = v.reshape(B, S, NUM_HEADS, HEAD_DIM).transpose(0, 2, 1, 3)
    s = jnp.einsum("bhqd,bhkd->bhqk", q, k, precision=hp) / math.sqrt(HEAD_DIM)
    a = jax.nn.softmax(s, axis=-1)
    o = jnp.einsum("bhqk,bhkd->bhqd", a, v, precision=hp).transpose(0, 2, 1, 3).reshape(B, S, H)
    o = jnp.dot(o, p["wout"].T, precision=hp) + p["bout"]
    x2 = o + x
    h2 = ln(x2, p["ln2_g"], p["ln2_b"])
    y = jnp.dot(h2, p["w1"].T, precision=hp) + p["b1"]
    y = 0.5 * y * (1.0 + jax.scipy.special.erf(y / math.sqrt(2.0)))
    y = jnp.dot(y, p["w2"].T, precision=hp) + p["b2"]
    return x2 + y


if __name__ == "__main__":
    key = jax.random.PRNGKey(0)
    kx, kp_key = jax.random.split(key)
    x = jax.random.normal(kx, (B, S, H), jnp.float32)
    params = init_params(kp_key)
    kparams = prepare_params(params)

    out = jax.block_until_ready(encoder_block(x, kparams))
    ref = encoder_block_ref(x, params)

    assert out.shape == (B, S, H), out.shape
    max_err = float(jnp.max(jnp.abs(out - ref)))
    # Exact softmax + f32 everywhere; bound only covers MXU f32 pass-decomposition
    # rounding and the 1.5e-7 erf polynomial (expected error ~1e-5).
    assert max_err < 2e-3, max_err
    print("KERNEL_OK")
</pallas_src>

<mosaic_0001>
module attributes {stable_mosaic.version = 11 : i64} {
  func.func @encoder_block_kernel(%arg0: memref<16x32xf32, #tpu.memory_space<vmem>>, %arg1: memref<160x128xf32, #tpu.memory_space<vmem>>, %arg2: memref<24x128xf32, #tpu.memory_space<vmem>>, %arg3: memref<16x32xf32, #tpu.memory_space<vmem>>) attributes {dimension_semantics = [], scalar_prefetch = 0 : i64, scratch_operands = 0 : i64, tpu.core_type = #tpu.core_type<tc>} {
    %c0 = arith.constant 0 : index
    %c0_0 = arith.constant 0 : index
    %0 = vector.load %arg0[%c0, %c0_0] : memref<16x32xf32, #tpu.memory_space<vmem>>, vector<16x32xf32>
    %c0_1 = arith.constant 0 : index
    %c0_2 = arith.constant 0 : index
    %1 = vector.load %arg2[%c0_1, %c0_2] : memref<24x128xf32, #tpu.memory_space<vmem>>, vector<1x32xf32>
    %c1 = arith.constant 1 : index
    %c0_3 = arith.constant 0 : index
    %2 = vector.load %arg2[%c1, %c0_3] : memref<24x128xf32, #tpu.memory_space<vmem>>, vector<1x32xf32>
    %c2 = arith.constant 2 : index
    %c0_4 = arith.constant 0 : index
    %3 = vector.load %arg2[%c2, %c0_4] : memref<24x128xf32, #tpu.memory_space<vmem>>, vector<1x96xf32>
    %c3 = arith.constant 3 : index
    %c0_5 = arith.constant 0 : index
    %4 = vector.load %arg2[%c3, %c0_5] : memref<24x128xf32, #tpu.memory_space<vmem>>, vector<1x32xf32>
    %c4 = arith.constant 4 : index
    %c0_6 = arith.constant 0 : index
    %5 = vector.load %arg2[%c4, %c0_6] : memref<24x128xf32, #tpu.memory_space<vmem>>, vector<1x32xf32>
    %c5 = arith.constant 5 : index
    %c0_7 = arith.constant 0 : index
    %6 = vector.load %arg2[%c5, %c0_7] : memref<24x128xf32, #tpu.memory_space<vmem>>, vector<1x32xf32>
    %c6 = arith.constant 6 : index
    %c0_8 = arith.constant 0 : index
    %7 = vector.load %arg2[%c6, %c0_8] : memref<24x128xf32, #tpu.memory_space<vmem>>, vector<1x64xf32>
    %c7 = arith.constant 7 : index
    %c0_9 = arith.constant 0 : index
    %8 = vector.load %arg2[%c7, %c0_9] : memref<24x128xf32, #tpu.memory_space<vmem>>, vector<1x32xf32>
    %c8 = arith.constant 8 : index
    %c0_10 = arith.constant 0 : index
    %9 = vector.load %arg2[%c8, %c0_10] : memref<24x128xf32, #tpu.memory_space<vmem>>, vector<16x16xf32>
    %c0_11 = arith.constant 0 : index
    %c0_12 = arith.constant 0 : index
    %10 = vector.load %arg1[%c0_11, %c0_12] : memref<160x128xf32, #tpu.memory_space<vmem>>, vector<32x96xf32>
    %c32 = arith.constant 32 : index
    %c0_13 = arith.constant 0 : index
    %11 = vector.load %arg1[%c32, %c0_13] : memref<160x128xf32, #tpu.memory_space<vmem>>, vector<32x32xf32>
    %c64 = arith.constant 64 : index
    %c0_14 = arith.constant 0 : index
    %12 = vector.load %arg1[%c64, %c0_14] : memref<160x128xf32, #tpu.memory_space<vmem>>, vector<32x64xf32>
    %c96 = arith.constant 96 : index
    %c0_15 = arith.constant 0 : index
    %13 = vector.load %arg1[%c96, %c0_15] : memref<160x128xf32, #tpu.memory_space<vmem>>, vector<64x32xf32>
    %cst = arith.constant dense<0.000000e+00> : vector<16xf32>
    %14 = vector.multi_reduction <add>, %0, %cst [1] : vector<16x32xf32> to vector<16xf32>
    %15 = vector.shape_cast %14 : vector<16xf32> to vector<16x1xf32>
    %cst_16 = arith.constant 3.200000e+01 : f32
    %16 = vector.broadcast %cst_16 : f32 to vector<16x1xf32>
    %17 = arith.divf %15, %16 : vector<16x1xf32>
    %18 = vector.broadcast %17 : vector<16x1xf32> to vector<16x32xf32>
    %19 = arith.subf %0, %18 : vector<16x32xf32>
    %20 = arith.mulf %19, %19 : vector<16x32xf32>
    %cst_17 = arith.constant dense<0.000000e+00> : vector<16xf32>
    %21 = vector.multi_reduction <add>, %20, %cst_17 [1] : vector<16x32xf32> to vector<16xf32>
    %22 = vector.shape_cast %21 : vector<16xf32> to vector<16x1xf32>
    %cst_18 = arith.constant 3.200000e+01 : f32
    %23 = vector.broadcast %cst_18 : f32 to vector<16x1xf32>
    %24 = arith.divf %22, %23 : vector<16x1xf32>
    %25 = vector.broadcast %17 : vector<16x1xf32> to vector<16x32xf32>
    %26 = arith.subf %0, %25 : vector<16x32xf32>
    %cst_19 = arith.constant 9.99999997E-7 : f32
    %27 = vector.broadcast %cst_19 : f32 to vector<16x1xf32>
    %28 = arith.addf %24, %27 : vector<16x1xf32>
    %29 = math.rsqrt %28 : vector<16x1xf32>
    %30 = vector.broadcast %29 : vector<16x1xf32> to vector<16x32xf32>
    %31 = arith.mulf %26, %30 : vector<16x32xf32>
    %32 = vector.broadcast %1 : vector<1x32xf32> to vector<16x32xf32>
    %33 = arith.mulf %31, %32 : vector<16x32xf32>
    %34 = vector.broadcast %2 : vector<1x32xf32> to vector<16x32xf32>
    %35 = arith.addf %33, %34 : vector<16x32xf32>
    %cst_20 = arith.constant dense<0.000000e+00> : vector<16x96xf32>
    %36 = tpu.matmul %35, %10, %cst_20 {dimension_numbers = #tpu.dot_dimension_numbers<[1], [0], [0], [1], [0, 0, 1, 1], [], []>} : vector<16x32xf32>, vector<32x96xf32>, vector<16x96xf32> -> vector<16x96xf32>
    %37 = vector.broadcast %3 : vector<1x96xf32> to vector<16x96xf32>
    %38 = arith.addf %36, %37 : vector<16x96xf32>
    %39 = vector.extract_strided_slice %38 {offsets = [0, 0], sizes = [16, 8], strides = [1, 1]} : vector<16x96xf32> to vector<16x8xf32>
    %40 = vector.extract_strided_slice %38 {offsets = [0, 32], sizes = [16, 8], strides = [1, 1]} : vector<16x96xf32> to vector<16x8xf32>
    %41 = vector.extract_strided_slice %38 {offsets = [0, 64], sizes = [16, 8], strides = [1, 1]} : vector<16x96xf32> to vector<16x8xf32>
    "tpu.trace_start"() <{level = 10 : i32, message = "qd,kd->qk"}> : () -> ()
    %cst_21 = arith.constant dense<0.000000e+00> : vector<16x16xf32>
    %42 = tpu.matmul %39, %40, %cst_21 {dimension_numbers = #tpu.dot_dimension_numbers<[1], [1], [0], [0], [0, 0, 1, 0], [], []>} : vector<16x8xf32>, vector<16x8xf32>, vector<16x16xf32> -> vector<16x16xf32>
    "tpu.trace_stop"() : () -> ()
    %43 = arith.addf %42, %9 : vector<16x16xf32>
    %cst_22 = arith.constant dense<0xFF800000> : vector<16xf32>
    %44 = vector.multi_reduction <maximumf>, %43, %cst_22 [1] : vector<16x16xf32> to vector<16xf32>
    %45 = vector.shape_cast %44 : vector<16xf32> to vector<16x1xf32>
    %46 = vector.broadcast %45 : vector<16x1xf32> to vector<16x16xf32>
    %47 = arith.subf %43, %46 : vector<16x16xf32>
    %48 = math.exp %47 : vector<16x16xf32>
    %cst_23 = arith.constant dense<0.000000e+00> : vector<16xf32>
    %49 = vector.multi_reduction <add>, %48, %cst_23 [1] : vector<16x16xf32> to vector<16xf32>
    %50 = vector.shape_cast %49 : vector<16xf32> to vector<16x1xf32>
    %51 = vector.broadcast %50 : vector<16x1xf32> to vector<16x16xf32>
    %52 = arith.divf %48, %51 : vector<16x16xf32>
    %cst_24 = arith.constant dense<0.000000e+00> : vector<16x8xf32>
    %53 = tpu.matmul %52, %41, %cst_24 {dimension_numbers = #tpu.dot_dimension_numbers<[1], [0], [0], [1], [0, 0, 1, 1], [], []>} : vector<16x16xf32>, vector<16x8xf32>, vector<16x8xf32> -> vector<16x8xf32>
    %54 = vector.extract_strided_slice %38 {offsets = [0, 8], sizes = [16, 8], strides = [1, 1]} : vector<16x96xf32> to vector<16x8xf32>
    %55 = vector.extract_strided_slice %38 {offsets = [0, 40], sizes = [16, 8], strides = [1, 1]} : vector<16x96xf32> to vector<16x8xf32>
    %56 = vector.extract_strided_slice %38 {offsets = [0, 72], sizes = [16, 8], strides = [1, 1]} : vector<16x96xf32> to vector<16x8xf32>
    "tpu.trace_start"() <{level = 10 : i32, message = "qd,kd->qk"}> : () -> ()
    %cst_25 = arith.constant dense<0.000000e+00> : vector<16x16xf32>
    %57 = tpu.matmul %54, %55, %cst_25 {dimension_numbers = #tpu.dot_dimension_numbers<[1], [1], [0], [0], [0, 0, 1, 0], [], []>} : vector<16x8xf32>, vector<16x8xf32>, vector<16x16xf32> -> vector<16x16xf32>
    "tpu.trace_stop"() : () -> ()
    %58 = arith.addf %57, %9 : vector<16x16xf32>
    %cst_26 = arith.constant dense<0xFF800000> : vector<16xf32>
    %59 = vector.multi_reduction <maximumf>, %58, %cst_26 [1] : vector<16x16xf32> to vector<16xf32>
    %60 = vector.shape_cast %59 : vector<16xf32> to vector<16x1xf32>
    %61 = vector.broadcast %60 : vector<16x1xf32> to vector<16x16xf32>
    %62 = arith.subf %58, %61 : vector<16x16xf32>
    %63 = math.exp %62 : vector<16x16xf32>
    %cst_27 = arith.constant dense<0.000000e+00> : vector<16xf32>
    %64 = vector.multi_reduction <add>, %63, %cst_27 [1] : vector<16x16xf32> to vector<16xf32>
    %65 = vector.shape_cast %64 : vector<16xf32> to vector<16x1xf32>
    %66 = vector.broadcast %65 : vector<16x1xf32> to vector<16x16xf32>
    %67 = arith.divf %63, %66 : vector<16x16xf32>
    %cst_28 = arith.constant dense<0.000000e+00> : vector<16x8xf32>
    %68 = tpu.matmul %67, %56, %cst_28 {dimension_numbers = #tpu.dot_dimension_numbers<[1], [0], [0], [1], [0, 0, 1, 1], [], []>} : vector<16x16xf32>, vector<16x8xf32>, vector<16x8xf32> -> vector<16x8xf32>
    %69 = vector.extract_strided_slice %38 {offsets = [0, 16], sizes = [16, 8], strides = [1, 1]} : vector<16x96xf32> to vector<16x8xf32>
    %70 = vector.extract_strided_slice %38 {offsets = [0, 48], sizes = [16, 8], strides = [1, 1]} : vector<16x96xf32> to vector<16x8xf32>
    %71 = vector.extract_strided_slice %38 {offsets = [0, 80], sizes = [16, 8], strides = [1, 1]} : vector<16x96xf32> to vector<16x8xf32>
    "tpu.trace_start"() <{level = 10 : i32, message = "qd,kd->qk"}> : () -> ()
    %cst_29 = arith.constant dense<0.000000e+00> : vector<16x16xf32>
    %72 = tpu.matmul %69, %70, %cst_29 {dimension_numbers = #tpu.dot_dimension_numbers<[1], [1], [0], [0], [0, 0, 1, 0], [], []>} : vector<16x8xf32>, vector<16x8xf32>, vector<16x16xf32> -> vector<16x16xf32>
    "tpu.trace_stop"() : () -> ()
    %73 = arith.addf %72, %9 : vector<16x16xf32>
    %cst_30 = arith.constant dense<0xFF800000> : vector<16xf32>
    %74 = vector.multi_reduction <maximumf>, %73, %cst_30 [1] : vector<16x16xf32> to vector<16xf32>
    %75 = vector.shape_cast %74 : vector<16xf32> to vector<16x1xf32>
    %76 = vector.broadcast %75 : vector<16x1xf32> to vector<16x16xf32>
    %77 = arith.subf %73, %76 : vector<16x16xf32>
    %78 = math.exp %77 : vector<16x16xf32>
    %cst_31 = arith.constant dense<0.000000e+00> : vector<16xf32>
    %79 = vector.multi_reduction <add>, %78, %cst_31 [1] : vector<16x16xf32> to vector<16xf32>
    %80 = vector.shape_cast %79 : vector<16xf32> to vector<16x1xf32>
    %81 = vector.broadcast %80 : vector<16x1xf32> to vector<16x16xf32>
    %82 = arith.divf %78, %81 : vector<16x16xf32>
    %cst_32 = arith.constant dense<0.000000e+00> : vector<16x8xf32>
    %83 = tpu.matmul %82, %71, %cst_32 {dimension_numbers = #tpu.dot_dimension_numbers<[1], [0], [0], [1], [0, 0, 1, 1], [], []>} : vector<16x16xf32>, vector<16x8xf32>, vector<16x8xf32> -> vector<16x8xf32>
    %84 = vector.extract_strided_slice %38 {offsets = [0, 24], sizes = [16, 8], strides = [1, 1]} : vector<16x96xf32> to vector<16x8xf32>
    %85 = vector.extract_strided_slice %38 {offsets = [0, 56], sizes = [16, 8], strides = [1, 1]} : vector<16x96xf32> to vector<16x8xf32>
    %86 = vector.extract_strided_slice %38 {offsets = [0, 88], sizes = [16, 8], strides = [1, 1]} : vector<16x96xf32> to vector<16x8xf32>
    "tpu.trace_start"() <{level = 10 : i32, message = "qd,kd->qk"}> : () -> ()
    %cst_33 = arith.constant dense<0.000000e+00> : vector<16x16xf32>
    %87 = tpu.matmul %84, %85, %cst_33 {dimension_numbers = #tpu.dot_dimension_numbers<[1], [1], [0], [0], [0, 0, 1, 0], [], []>} : vector<16x8xf32>, vector<16x8xf32>, vector<16x16xf32> -> vector<16x16xf32>
    "tpu.trace_stop"() : () -> ()
    %88 = arith.addf %87, %9 : vector<16x16xf32>
    %cst_34 = arith.constant dense<0xFF800000> : vector<16xf32>
    %89 = vector.multi_reduction <maximumf>, %88, %cst_34 [1] : vector<16x16xf32> to vector<16xf32>
    %90 = vector.shape_cast %89 : vector<16xf32> to vector<16x1xf32>
    %91 = vector.broadcast %90 : vector<16x1xf32> to vector<16x16xf32>
    %92 = arith.subf %88, %91 : vector<16x16xf32>
    %93 = math.exp %92 : vector<16x16xf32>
    %cst_35 = arith.constant dense<0.000000e+00> : vector<16xf32>
    %94 = vector.multi_reduction <add>, %93, %cst_35 [1] : vector<16x16xf32> to vector<16xf32>
    %95 = vector.shape_cast %94 : vector<16xf32> to vector<16x1xf32>
    %96 = vector.broadcast %95 : vector<16x1xf32> to vector<16x16xf32>
    %97 = arith.divf %93, %96 : vector<16x16xf32>
    %cst_36 = arith.constant dense<0.000000e+00> : vector<16x8xf32>
    %98 = tpu.matmul %97, %86, %cst_36 {dimension_numbers = #tpu.dot_dimension_numbers<[1], [0], [0], [1], [0, 0, 1, 1], [], []>} : vector<16x16xf32>, vector<16x8xf32>, vector<16x8xf32> -> vector<16x8xf32>
    %99 = tpu.concatenate %53, %68, %83, %98 in 1 : vector<16x8xf32>, vector<16x8xf32>, vector<16x8xf32>, vector<16x8xf32> -> vector<16x32xf32>
    %cst_37 = arith.constant dense<0.000000e+00> : vector<16x32xf32>
    %100 = tpu.matmul %99, %11, %cst_37 {dimension_numbers = #tpu.dot_dimension_numbers<[1], [0], [0], [1], [0, 0, 1, 1], [], []>} : vector<16x32xf32>, vector<32x32xf32>, vector<16x32xf32> -> vector<16x32xf32>
    %101 = vector.broadcast %4 : vector<1x32xf32> to vector<16x32xf32>
    %102 = arith.addf %100, %101 : vector<16x32xf32>
    %103 = arith.addf %102, %0 : vector<16x32xf32>
    %cst_38 = arith.constant dense<0.000000e+00> : vector<16xf32>
    %104 = vector.multi_reduction <add>, %103, %cst_38 [1] : vector<16x32xf32> to vector<16xf32>
    %105 = vector.shape_cast %104 : vector<16xf32> to vector<16x1xf32>
    %cst_39 = arith.constant 3.200000e+01 : f32
    %106 = vector.broadcast %cst_39 : f32 to vector<16x1xf32>
    %107 = arith.divf %105, %106 : vector<16x1xf32>
    %108 = vector.broadcast %107 : vector<16x1xf32> to vector<16x32xf32>
    %109 = arith.subf %103, %108 : vector<16x32xf32>
    %110 = arith.mulf %109, %109 : vector<16x32xf32>
    %cst_40 = arith.constant dense<0.000000e+00> : vector<16xf32>
    %111 = vector.multi_reduction <add>, %110, %cst_40 [1] : vector<16x32xf32> to vector<16xf32>
    %112 = vector.shape_cast %111 : vector<16xf32> to vector<16x1xf32>
    %cst_41 = arith.constant 3.200000e+01 : f32
    %113 = vector.broadcast %cst_41 : f32 to vector<16x1xf32>
    %114 = arith.divf %112, %113 : vector<16x1xf32>
    %115 = vector.broadcast %107 : vector<16x1xf32> to vector<16x32xf32>
    %116 = arith.subf %103, %115 : vector<16x32xf32>
    %cst_42 = arith.constant 9.99999997E-7 : f32
    %117 = vector.broadcast %cst_42 : f32 to vector<16x1xf32>
    %118 = arith.addf %114, %117 : vector<16x1xf32>
    %119 = math.rsqrt %118 : vector<16x1xf32>
    %120 = vector.broadcast %119 : vector<16x1xf32> to vector<16x32xf32>
    %121 = arith.mulf %116, %120 : vector<16x32xf32>
    %122 = vector.broadcast %5 : vector<1x32xf32> to vector<16x32xf32>
    %123 = arith.mulf %121, %122 : vector<16x32xf32>
    %124 = vector.broadcast %6 : vector<1x32xf32> to vector<16x32xf32>
    %125 = arith.addf %123, %124 : vector<16x32xf32>
    %cst_43 = arith.constant dense<0.000000e+00> : vector<16x64xf32>
    %126 = tpu.matmul %125, %12, %cst_43 {dimension_numbers = #tpu.dot_dimension_numbers<[1], [0], [0], [1], [0, 0, 1, 1], [], []>} : vector<16x32xf32>, vector<32x64xf32>, vector<16x64xf32> -> vector<16x64xf32>
    %127 = vector.broadcast %7 : vector<1x64xf32> to vector<16x64xf32>
    %128 = arith.addf %126, %127 : vector<16x64xf32>
    %cst_44 = arith.constant 5.000000e-01 : f32
    %129 = vector.broadcast %cst_44 : f32 to vector<16x64xf32>
    %130 = arith.mulf %129, %128 : vector<16x64xf32>
    %cst_45 = arith.constant 0.707106769 : f32
    %131 = vector.broadcast %cst_45 : f32 to vector<16x64xf32>
    %132 = arith.mulf %128, %131 : vector<16x64xf32>
    %cst_46 = arith.constant 0.000000e+00 : f32
    %133 = vector.broadcast %cst_46 : f32 to vector<16x64xf32>
    %134 = arith.cmpf olt, %132, %133 : vector<16x64xf32>
    %cst_47 = arith.constant -1.000000e+00 : f32
    %cst_48 = arith.constant 1.000000e+00 : f32
    %135 = vector.broadcast %cst_47 : f32 to vector<16x64xf32>
    %136 = vector.broadcast %cst_48 : f32 to vector<16x64xf32>
    %137 = arith.select %134, %135, %136 : vector<16x64xi1>, vector<16x64xf32>
    %138 = math.absf %132 : vector<16x64xf32>
    %cst_49 = arith.constant 0.327591091 : f32
    %139 = vector.broadcast %cst_49 : f32 to vector<16x64xf32>
    %140 = arith.mulf %139, %138 : vector<16x64xf32>
    %cst_50 = arith.constant 1.000000e+00 : f32
    %141 = vector.broadcast %cst_50 : f32 to vector<16x64xf32>
    %142 = arith.addf %141, %140 : vector<16x64xf32>
    %cst_51 = arith.constant 1.000000e+00 : f32
    %143 = vector.broadcast %cst_51 : f32 to vector<16x64xf32>
    %144 = arith.divf %143, %142 : vector<16x64xf32>
    %cst_52 = arith.constant 1.06140542 : f32
    %145 = vector.broadcast %cst_52 : f32 to vector<16x64xf32>
    %146 = arith.mulf %145, %144 : vector<16x64xf32>
    %cst_53 = arith.constant -1.45315206 : f32
    %147 = vector.broadcast %cst_53 : f32 to vector<16x64xf32>
    %148 = arith.addf %146, %147 : vector<16x64xf32>
    %149 = arith.mulf %148, %144 : vector<16x64xf32>
    %cst_54 = arith.constant 1.42141378 : f32
    %150 = vector.broadcast %cst_54 : f32 to vector<16x64xf32>
    %151 = arith.addf %149, %150 : vector<16x64xf32>
    %152 = arith.mulf %151, %144 : vector<16x64xf32>
    %cst_55 = arith.constant -0.284496725 : f32
    %153 = vector.broadcast %cst_55 : f32 to vector<16x64xf32>
    %154 = arith.addf %152, %153 : vector<16x64xf32>
    %155 = arith.mulf %154, %144 : vector<16x64xf32>
    %cst_56 = arith.constant 0.254829586 : f32
    %156 = vector.broadcast %cst_56 : f32 to vector<16x64xf32>
    %157 = arith.addf %155, %156 : vector<16x64xf32>
    %158 = arith.mulf %157, %144 : vector<16x64xf32>
    %cst_57 = arith.constant 0.000000e+00 : f32
    %159 = vector.broadcast %cst_57 : f32 to vector<16x64xf32>
    %160 = arith.subf %159, %138 : vector<16x64xf32>
    %161 = arith.mulf %160, %138 : vector<16x64xf32>
    %162 = math.exp %161 : vector<16x64xf32>
    %163 = arith.mulf %158, %162 : vector<16x64xf32>
    %cst_58 = arith.constant 1.000000e+00 : f32
    %164 = vector.broadcast %cst_58 : f32 to vector<16x64xf32>
    %165 = arith.subf %164, %163 : vector<16x64xf32>
    %166 = arith.mulf %137, %165 : vector<16x64xf32>
    %cst_59 = arith.constant 1.000000e+00 : f32
    %167 = vector.broadcast %cst_59 : f32 to vector<16x64xf32>
    %168 = arith.addf %167, %166 : vector<16x64xf32>
    %169 = arith.mulf %130, %168 : vector<16x64xf32>
    %cst_60 = arith.constant dense<0.000000e+00> : vector<16x32xf32>
    %170 = tpu.matmul %169, %13, %cst_60 {dimension_numbers = #tpu.dot_dimension_numbers<[1], [0], [0], [1], [0, 0, 1, 1], [], []>} : vector<16x64xf32>, vector<64x32xf32>, vector<16x32xf32> -> vector<16x32xf32>
    %171 = vector.broadcast %8 : vector<1x32xf32> to vector<16x32xf32>
    %172 = arith.addf %170, %171 : vector<16x32xf32>
    %173 = arith.addf %103, %172 : vector<16x32xf32>
    %c0_61 = arith.constant 0 : index
    %c0_62 = arith.constant 0 : index
    %174 = vector.load %arg3[%c0_61, %c0_62] : memref<16x32xf32, #tpu.memory_space<vmem>>, vector<16x32xf32>
    tpu.vector_store %arg3[%c0_61, %c0_62], %173 {strides = array<i32>} : memref<16x32xf32, #tpu.memory_space<vmem>>, vector<16x32xf32>,
    return
  }
}

</mosaic_0001>

<bundles_post_ra>
// kernel: tpu_custom_call.1
= control target key start
LH: loop header
LB: loop body
LE: loop exit
PB: predicated region body
PF: predicated region fallthrough
CT: control target
= control target key end

     0   :  { %8 = vsyncpa [#allocation3], 0  ;;  %s2157_s0 = inlined_call_operand.hbm [shape: f32[16,32], index: 0, kind: input, shape index: {}]   ;;  %s2158_s1 = inlined_call_operand.hbm [shape: f32[160,128], index: 1, kind: input, shape index: {}]   ;;  %s2159_s2 = inlined_call_operand.hbm [shape: f32[24,128], index: 2, kind: input, shape index: {}]   ;;  %s2160_s3 = inlined_call_operand.hbm [shape: f32[16,32], index: 3, kind: output, shape index: {}]  }
   0x1   :  { %9 = vsyncpa [#allocation6], 0 }
   0x2   :  { %10 = vsyncpa [#allocation4], 0  ;;  %s1906_s12 = smov [#allocation5]   ;;  %s1907_s14 = smov [#allocation2]  }
   0x3   :  { %s28_s13 = sshll.u32 %s1906_s12, 4  ;;  %s16_s15 = sshll.u32 %s1907_s14, 4  ;;  %s29_s13 = int_to_ptr.vmem [resolvable:$true] %s28_s13  ;;  %s1946_s15 = int_to_ptr.vmem [resolvable:$true] %s16_s15 }
   0x4   :  { %s1812_s18 = scalar_lea.hbm %s2158_s1, 2560 }
   0x5   :  { %p1813_p0 = scmp.ne.s32.totalorder %s2158_s1, %s1812_s18  ;;  %p1816_p1 = scmp.lt.u32.totalorder %s1812_s18, %s2158_s1 }
   0x7   :  { %p1818_p2 = pnand %p1816_p1, %p1813_p0 }
   0x9   :  { %1821 = shalt.err (!%p1818_p2)
}
   0xa   :  { %s1822_s23 = scalar_lea.vmem %s29_s13, 2560  ;;  %p1827_p4 = scmp.lt.s32.totalorder %s29_s13, %s29_s13 }
   0xb   :  { %p1823_p3 = scmp.ne.s32.totalorder %s29_s13, %s1822_s23  ;;  %p1828_p5 = scmp.lt.s32.totalorder %s1822_s23, %s1822_s23 }
   0xd   :  { %p1829_p6 = por %p1828_p5, %p1827_p4 }
   0xf   :  { %p1830_p7 = pnand %p1829_p6, %p1823_p3 }
  0x11   :  { %1833 = shalt.err (!%p1830_p7)
}
  0x12   :  { %s1908_s24 = smov 128   ;;  %s1909_s25 = smov 8  }
  0x13   :  { %34 = dma.hbm_to_vmem [thread:$0]  %s2158_s1, 2560, %s29_s13, [#allocation6], %s1908_s24, %s1908_s24, %s1909_s25  }
  0x14   :  { %s1834_s30 = scalar_lea.hbm %s2157_s0, 256 }
  0x15   :  { %p1835_p8 = scmp.ne.s32.totalorder %s2157_s0, %s1834_s30  ;;  %p1838_p9 = scmp.lt.u32.totalorder %s1834_s30, %s2157_s0 }
  0x17   :  { %p1840_p10 = pnand %p1838_p9, %p1835_p8 }
  0x19   :  { %1843 = shalt.err (!%p1840_p10)
}
  0x1a   :  { %s1844_s8 = scalar_lea.vmem %s1946_s15, 256  ;;  %p1849_p12 = scmp.lt.s32.totalorder %s1946_s15, %s1946_s15 }
  0x1b   :  { %p1845_p11 = scmp.ne.s32.totalorder %s1946_s15, %s1844_s8  ;;  %p1850_p13 = scmp.lt.s32.totalorder %s1844_s8, %s1844_s8 }
  0x1d   :  { %p1851_p0 = por %p1850_p13, %p1849_p12 }
  0x1f   :  { %p1852_p1 = pnand %p1851_p0, %p1845_p11 }
  0x21   :  { %1855 = shalt.err (!%p1852_p1)
}
  0x22   :  { %22 = dma.hbm_to_vmem [thread:$0]  %s2157_s0, 256, %s1946_s15, [#allocation3], %s1908_s24, %s1908_s24, %s1909_s25  }
  0x23   :  { %s1910_s10 = smov [#allocation7]   ;;  %s1856_s14 = scalar_lea.hbm %s2159_s2, 384 }
  0x24   :  { %s40_s11 = sshll.u32 %s1910_s10, 4  ;;  %p1857_p2 = scmp.ne.s32.totalorder %s2159_s2, %s1856_s14  ;;  %s41_s11 = int_to_ptr.vmem [resolvable:$true] %s40_s11 }
  0x25   :  { %p1860_p3 = scmp.lt.u32.totalorder %s1856_s14, %s2159_s2 }
  0x27   :  { %p1862_p4 = pnand %p1860_p3, %p1857_p2 }
  0x29   :  { %1865 = shalt.err (!%p1862_p4)
}
  0x2a   :  { %s1866_s20 = scalar_lea.vmem %s41_s11, 384  ;;  %p1871_p6 = scmp.lt.s32.totalorder %s41_s11, %s41_s11 }
  0x2b   :  { %p1867_p5 = scmp.ne.s32.totalorder %s41_s11, %s1866_s20  ;;  %p1872_p7 = scmp.lt.s32.totalorder %s1866_s20, %s1866_s20 }
  0x2d   :  { %p1873_p8 = por %p1872_p7, %p1871_p6 }
  0x2f   :  { %p1874_p9 = pnand %p1873_p8, %p1867_p5 }
  0x31   :  { %1877 = shalt.err (!%p1874_p9)
}
  0x32   :  { %46 = dma.hbm_to_vmem [thread:$0]  %s2159_s2, 384, %s41_s11, [#allocation6], %s1908_s24, %s1908_s24, %s1909_s25  }
  0x33   :  { %1900 = dma.done.wait [#allocation3], 256  }
  0x34   :  { %1901 = vsyncadd [#allocation3], 4294967040 }
  0x35   :  { %1902 = dma.done.wait [#allocation6], 2944  }
  0x36   :  { %1903 = vsyncadd [#allocation6], 4294964352  ;;  %vm88_vm0 = vcmask 261120   ;;  %v1998_v0 = vld [vmem:[#allocation2] sm:$0xff]  ;;  %v2000_v1 = vld [vmem:[#allocation2 + $0x8] sm:$0xff]  ;;  %vm219_vm1 = vcmask 64512  }
  0x37   :  { %v89_v2 = vsel %vm88_vm0, %v1998_v0, 0.0  ;;  %v92_v3 = vsel %vm88_vm0, %v2000_v1, 0.0  ;;  %v68_v14 = vld [vmem:[#allocation5] sm:$0xff]  ;;  %v69_v15 = vld [vmem:[#allocation5 + $0x8] sm:$0xff]  ;;  %v70_v16 = vld [vmem:[#allocation5 + $0x10] sm:$0xff]  ;;  %s1911_s2 = smov 88  }
  0x38   :  { %90 = vadd.xlane.f32.xlu0 %v89_v2  ;;  %v1624_v17 = vpack.c.bf16 %v69_v15, %v68_v14  ;;  %v71_v18 = vld [vmem:[#allocation5 + $0x18] sm:$0xff]  ;;  %v1416_v27 = vld [vmem:[#allocation7] ss:$0 sm:$0xff]  ;;  %v1417_v29 = vld [vmem:[#allocation7 + $0x1] ss:$0 sm:$0xff]  ;;  %s1912_s21 = smov 96  }
  0x39   :  { %v1628_v19 = vpack.c.bf16 %v71_v18, %v70_v16  ;;  %v1418_v36 = vld [vmem:[#allocation7 + $0x2] ss:$0 sm:$0xff]  ;;  %s1913_s22 = smov 120   ;;  %vm2028_vm2 = vmpackc.low %vm219_vm1, %vm219_vm1  ;;  %v2044_v53 = vld [vmem:[#allocation7 + $0x10] sm:$0xff]  ;;  %vm303_vm3 = vcmask 130048   ;;  %s1914_s23 = smov 56  }
  0x3a   :  { %1625 = vmatprep.subr.bf16.mxu1 %v1624_v17  ;;  %v2046_v54 = vld [vmem:[#allocation7 + $0x8] sm:$0xff]  ;;  %s1915_s26 = smov 64   ;;  %s1916_s27 = smov 80   ;;  %vm1041_vm4 = vcmask 195584   ;;  %vm1312_vm7 = vcmask 523264  }
  0x3b   :  { %1627 = vmatpush3.bf16.msra.mxu1 %v1624_v17  ;;  %s1917_s28 = smov 112   ;;  %s1918_s29 = smov 48  }
  0x3c   :  { %93 = vadd.xlane.f32.xlu0 %v92_v3  ;;  %1629 = vmatprep.subr.bf16.mxu1 %v1628_v19  ;;  %s1919_s30 = smov 104   ;;  %s1920_s4 = smov 72  }
  0x3d   :  { %s1921_s5 = smov 40   ;;  %s1922_s6 = smov 16  }
  0x3e   :  { %s1923_s7 = smov 24   ;;  %s1925_s8 = smov [#allocation8]  }
  0x3f   :  { %1631 = vmatpush3.bf16.msra.mxu1 %v1628_v19  ;;  %s1403_s1 = sshll.u32 %s1925_s8, 4  ;;  %s1404_s1 = int_to_ptr.vmem [resolvable:$true] %s1403_s1 }
  0x40   :  { %s1878_s9 = scalar_lea.vmem %s1404_s1, 256  ;;  %p1883_p11 = scmp.lt.s32.totalorder %s1404_s1, %s1404_s1 }
  0x41   :  { %p1879_p10 = scmp.ne.s32.totalorder %s1404_s1, %s1878_s9  ;;  %p1884_p12 = scmp.lt.s32.totalorder %s1878_s9, %s1878_s9 }
  0x43   :  { %p1885_p13 = por %p1884_p12, %p1883_p11 }
  0x45   :  { %p1886_p0 = pnand %p1885_p13, %p1879_p10 }
  0xc5   :  { %v91_v4 = vpop.xlane.xlu0 %90 }
  0xc6   :  { %v96_v5 = vmul.f32 0.03125, %v91_v4 }
  0xc8   :  { %v98_v6 = vsub.f32 %v1998_v0, %v96_v5 }
  0xc9   :  { %v94_v7 = vpop.xlane.xlu0 %93 }
  0xca   :  { %v97_v8 = vmul.f32 0.03125, %v94_v7  ;;  %v100_v9 = vmul.f32 %v98_v6, %v98_v6 }
  0xcc   :  { %v99_v10 = vsub.f32 %v2000_v1, %v97_v8  ;;  %v102_v11 = vsel %vm88_vm0, %v100_v9, 0.0 }
  0xcd   :  { %103 = vadd.xlane.f32.xlu1 %v102_v11 }
  0xce   :  { %v101_v12 = vmul.f32 %v99_v10, %v99_v10 }
  0xd0   :  { %v105_v13 = vsel %vm88_vm0, %v101_v12, 0.0 }
  0xd1   :  { %106 = vadd.xlane.f32.xlu1 %v105_v13 }
 0x15a   :  { %v104_v20 = vpop.xlane.xlu1 %103 }
 0x15b   :  { %v108_v21 = vmul.f32 0.03125, %v104_v20 }
 0x15d   :  { %v110_v22 = vadd.f32 1e-06, %v108_v21 }
 0x15e   :  { %v107_v23 = vpop.xlane.xlu1 %106 }
 0x15f   :  { %1764 = vrsqrt.f32 %v110_v22  ;;  %v109_v24 = vmul.f32 0.03125, %v107_v23 }
 0x161   :  { %v111_v25 = vadd.f32 1e-06, %v109_v24 }
 0x163   :  { %1766 = vrsqrt.f32 %v111_v25 }
 0x169   :  { %v1765_v26 = vpop.eup %1764 }
 0x16a   :  { %v114_v28 = vmul.f32 %v1765_v26, %v98_v6 }
 0x16c   :  { %v120_v30 = vmul.f32 %v1416_v27, %v114_v28 }
 0x16d   :  { %v1767_v31 = vpop.eup %1766 }
 0x16e   :  { %v115_v32 = vmul.f32 %v1767_v31, %v99_v10  ;;  %v126_v33 = vadd.f32 %v1417_v29, %v120_v30 }
 0x170   :  { %v121_v34 = vmul.f32 %v1416_v27, %v115_v32  ;;  %1524 = vmatprep.mubr.msk.f32.mxu1 %vm88_vm0, %v126_v33 }
 0x172   :  { %v127_v35 = vadd.f32 %v1417_v29, %v121_v34 }
 0x174   :  { %1525 = vmatmul.mubr.msk.f32.vlgmr.msra.gmra.mrb[0].mxu1 %vm88_vm0, %v127_v35 }
 0x247   :  { %v1526_v37 = vpop.f32.mrb[0].mxu1 }
 0x248   :  { %v2012_v38 = vadd.f32 %v1526_v37, %v1418_v36  ;;  %v204_v39 = vpop.f32.mrb[1].mxu1 }
 0x249   :  { %v2014_v40 = vadd.f32 %v1418_v36, %v204_v39 }
 0x24b   :  { %1531 = vmatprep.mubr.msk.f32.mxu1 %vm219_vm1, %v2014_v40  ;;  %v2020_v41 = vpack.i.bf16 %v2012_v38, %v2014_v40 }
 0x24d   :  { %1730 = vrot.lane.b32.xlu1 %v2020_v41, %s1911_s2  ;;  %1725 = vrot.lane.b32.xlu0 %v2020_v41, %s1912_s21 }
 0x251   :  { %413 = vrot.lane.b32.xlu1 %v2014_v40, %s1913_s22 }
 0x255   :  { %415 = vrot.lane.b32.xlu1 %v2012_v38, %s1913_s22 }
 0x2bf   :  { %v1731_v42 = vpop.permute.xlu1 %1730  ;;  %v1726_v43 = vpop.permute.xlu0 %1725 }
 0x2c0   :  { %v1733_v44 = vunpack.i.h.bf16 %v1731_v42  ;;  %v1732_v45 = vunpack.i.l.bf16 %v1731_v42  ;;  %v1728_v46 = vunpack.i.h.bf16 %v1726_v43  ;;  %v1727_v47 = vunpack.i.l.bf16 %v1726_v43 }
 0x2c2   :  { %v1632_v49 = vpack.c.bf16 %v1728_v46, %v1727_v47  ;;  %v1642_v50 = vpack.c.bf16 %v1733_v44, %v1732_v45 }
 0x2c3   :  { %v414_v51 = vpop.permute.xlu1 %413 }
 0x2c4   :  { %1634 = vmatprep.subr.msk.bf16.mxu1 %vm2028_vm2, %v1632_v49 }
 0x2c5   :  { %1637 = vmatpush3.bf16.xpose.msk.msra.mxu1 %vm2028_vm2, %v1632_v49 }
 0x2c6   :  { %1644 = vmatprep.subr.msk.bf16.mxu1 %vm2028_vm2, %v1642_v50 }
 0x2c7   :  { %v416_v52 = vpop.permute.xlu1 %415 }
 0x2cc   :  { %1532 = vmatmul.mubr.msk.f32.vlgmr.msra.gmra.mrb[2].mxu1 %vm219_vm1, %v2012_v38 }
 0x2cd   :  { %1647 = vmatpush3.bf16.xpose.msk.msra.mxu1 %vm2028_vm2, %v1642_v50  ;;  %1545 = vmatprep.mubr.msk.f32.mxu1 %vm219_vm1, %v414_v51 }
 0x2d4   :  { %1546 = vmatmul.mubr.msk.f32.vlgmr.msra.gmra.mrb[4].mxu1 %vm219_vm1, %v416_v52 }
 0x39f   :  { %v1533_v55 = vpop.f32.mrb[2].mxu1 }
 0x3a0   :  { %v300_v56 = vadd.f32 %v1533_v55, %v2044_v53  ;;  %v294_v57 = vpop.f32.mrb[3].mxu1 }
 0x3a1   :  { %v295_v58 = vadd.f32 %v294_v57, %v2046_v54 }
 0x3a2   :  { %v307_v59 = vsel %vm303_vm3, %v300_v56, -inf }
 0x3a3   :  { %308 = vmax.xlane.f32.xlu1 %v307_v59  ;;  %v304_v60 = vsel %vm303_vm3, %v295_v58, -inf }
 0x3a4   :  { %305 = vmax.xlane.f32.xlu0 %v304_v60 }
 0x3a7   :  { %v1547_v61 = vpop.f32.mrb[4].mxu1 }
 0x3a8   :  { %v495_v62 = vpop.f32.mrb[5].mxu1  ;;  %v501_v2 = vadd.f32 %v1547_v61, %v2044_v53 }
 0x3a9   :  { %v496_v63 = vadd.f32 %v495_v62, %v2046_v54 }
 0x3aa   :  { %v507_v4 = vsel %vm303_vm3, %v501_v2, -inf }
 0x3ab   :  { %v504_v3 = vsel %vm303_vm3, %v496_v63, -inf }
 0x3ac   :  { %505 = vmax.xlane.f32.xlu0 %v504_v3 }
 0x3b0   :  { %508 = vmax.xlane.f32.xlu0 %v507_v4 }
 0x430   :  { %v309_v5 = vpop.xlane.xlu1 %308 }
 0x431   :  { %v311_v6 = vsub.f32 %v300_v56, %v309_v5  ;;  %v306_v7 = vpop.xlane.xlu0 %305 }
 0x432   :  { %v310_v8 = vsub.f32 %v295_v58, %v306_v7 }
 0x433   :  { %v314_v9 = vmul.f32 1.442695, %v311_v6 }
 0x434   :  { %v312_v10 = vmul.f32 1.442695, %v310_v8 }
 0x435   :  { %1768 = vpow2.f32 %v314_v9 }
 0x436   :  { %1770 = vpow2.f32 %v312_v10 }
 0x439   :  { %v506_v11 = vpop.xlane.xlu0 %505 }
 0x43a   :  { %v510_v12 = vsub.f32 %v496_v63, %v506_v11 }
 0x43c   :  { %v512_v13 = vmul.f32 1.442695, %v510_v12 }
 0x43d   :  { %v509_v14 = vpop.xlane.xlu0 %508 }
 0x43e   :  { %1772 = vpow2.f32 %v512_v13  ;;  %v511_v15 = vsub.f32 %v501_v2, %v509_v14 }
 0x43f   :  { %v1769_v16 = vpop.eup %1768 }
 0x440   :  { %v1771_v17 = vpop.eup %1770  ;;  %v514_v18 = vmul.f32 1.442695, %v511_v15  ;;  %v319_v19 = vsel %vm303_vm3, %v1769_v16, 0.0 }
 0x441   :  { %320 = vadd.xlane.f32.xlu1 %v319_v19  ;;  %v316_v20 = vsel %vm303_vm3, %v1771_v17, 0.0 }
 0x442   :  { %1774 = vpow2.f32 %v514_v18  ;;  %317 = vadd.xlane.f32.xlu0 %v316_v20 }
 0x448   :  { %v1773_v21 = vpop.eup %1772 }
 0x449   :  { %v516_v22 = vsel %vm303_vm3, %v1773_v21, 0.0 }
 0x44a   :  { %517 = vadd.xlane.f32.xlu0 %v516_v22 }
 0x44c   :  { %v1775_v23 = vpop.eup %1774 }
 0x44d   :  { %v519_v24 = vsel %vm303_vm3, %v1775_v23, 0.0 }
 0x44e   :  { %520 = vadd.xlane.f32.xlu1 %v519_v24 }
 0x45f   :  { %1740 = vrot.lane.b32.xlu1 %v2020_v41, %s1914_s23 }
 0x460   :  { %1735 = vrot.lane.b32.xlu0 %v2020_v41, %s1915_s26 }
 0x463   :  { %1745 = vrot.lane.b32.xlu1 %v2020_v41, %s1916_s27 }
 0x464   :  { %615 = vrot.lane.b32.xlu0 %v2012_v38, %s1917_s28 }
 0x467   :  { %613 = vrot.lane.b32.xlu1 %v2014_v40, %s1917_s28 }
 0x4ce   :  { %v321_v26 = vpop.xlane.xlu1 %320 }
 0x4cf   :  { %v318_v25 = vpop.xlane.xlu0 %317 }
 0x4d0   :  { %1776 = vrcp.f32 %v318_v25 }
 0x4d1   :  { %1778 = vrcp.f32 %v321_v26 }
 0x4d7   :  { %v518_v27 = vpop.xlane.xlu0 %517 }
 0x4d8   :  { %1780 = vrcp.f32 %v518_v27 }
 0x4da   :  { %v1777_v28 = vpop.eup %1776 }
 0x4db   :  { %v521_v29 = vpop.xlane.xlu1 %520  ;;  %v1736_v30 = vpop.permute.xlu0 %1735  ;;  %v323_v31 = vmul.f32 %v1777_v28, %v1771_v17 }
 0x4dc   :  { %1782 = vrcp.f32 %v521_v29  ;;  %v1738_v32 = vunpack.i.h.bf16 %v1736_v30  ;;  %v1737_v33 = vunpack.i.l.bf16 %v1736_v30  ;;  %v1779_v35 = vpop.eup %1778 }
 0x4dd   :  { %1538 = vmatprep.mubr.msk.f32.mxu0 %vm303_vm3, %v323_v31  ;;  %v325_v44 = vmul.f32 %v1779_v35, %v1769_v16 }
 0x4de   :  { %v1638_v34 = vpack.c.bf16 %v1738_v32, %v1737_v33 }
 0x4df   :  { %v1741_v36 = vpop.permute.xlu1 %1740  ;;  %v616_v56 = vpop.permute.xlu0 %615 }
 0x4e0   :  { %v1743_v37 = vunpack.i.h.bf16 %v1741_v36  ;;  %v1742_v39 = vunpack.i.l.bf16 %v1741_v36  ;;  %1639 = vmatprep.subr.bf16.mxu0 %v1638_v34 }
 0x4e1   :  { %1641 = vmatpush3.bf16.msra.mxu0 %v1638_v34 }
 0x4e2   :  { %v1781_v42 = vpop.eup %1780  ;;  %v1648_v43 = vpack.c.bf16 %v1743_v37, %v1742_v39 }
 0x4e3   :  { %v1746_v45 = vpop.permute.xlu1 %1745  ;;  %v523_v46 = vmul.f32 %v1781_v42, %v1773_v21 }
 0x4e4   :  { %v1748_v47 = vunpack.i.h.bf16 %v1746_v45  ;;  %v1747_v49 = vunpack.i.l.bf16 %v1746_v45  ;;  %1539 = vmatmul.mubr.msk.f32.vlgmr.msra.gmra.mrb[0].mxu0 %vm303_vm3, %v325_v44  ;;  %1649 = vmatprep.subr.bf16.mxu0 %v1648_v43 }
 0x4e5   :  { %1651 = vmatpush3.bf16.msra.mxu0 %v1648_v43  ;;  %1552 = vmatprep.mubr.msk.f32.mxu0 %vm303_vm3, %v523_v46 }
 0x4e6   :  { %v1783_v50 = vpop.eup %1782  ;;  %v1652_v51 = vpack.c.bf16 %v1748_v47, %v1747_v49 }
 0x4e7   :  { %v525_v52 = vmul.f32 %v1783_v50, %v1775_v23  ;;  %v614_v55 = vpop.permute.xlu1 %613 }
 0x4e8   :  { %1654 = vmatprep.subr.msk.bf16.mxu0 %vm2028_vm2, %v1652_v51 }
 0x4e9   :  { %1553 = vmatmul.mubr.msk.f32.vlgmr.msra.gmra.mrb[2].mxu0 %vm303_vm3, %v525_v52 }
 0x4ea   :  { %1559 = vmatprep.mubr.msk.f32.mxu0 %vm219_vm1, %v614_v55 }
 0x4ee   :  { %1657 = vmatpush3.bf16.xpose.msk.msra.mxu0 %vm2028_vm2, %v1652_v51 }
 0x4f5   :  { %1560 = vmatmul.mubr.msk.f32.vlgmr.msra.gmra.mrb[4].mxu0 %vm219_vm1, %v616_v56 }
 0x5b7   :  { %v2075_v57 = vpop.f32.mrb[0].mxu0 }
 0x5b8   :  { %v2077_v58 = vpop.f32.mrb[1].mxu0 }
 0x5bc   :  { %v2079_v59 = vpop.f32.mrb[2].mxu0 }
 0x5bd   :  { %v2081_v60 = vpop.f32.mrb[3].mxu0 }
 0x5c8   :  { %v1561_v61 = vpop.f32.mrb[4].mxu0 }
 0x5c9   :  { %v701_v62 = vadd.f32 %v1561_v61, %v2044_v53  ;;  %v695_v63 = vpop.f32.mrb[5].mxu0 }
 0x5ca   :  { %v696_v2 = vadd.f32 %v695_v63, %v2046_v54  ;;  %v73_v63 = vld [vmem:[#allocation5 + $0x28] sm:$0xff] }
 0x5cb   :  { %v707_v3 = vsel %vm303_vm3, %v701_v62, -inf }
 0x5cc   :  { %708 = vmax.xlane.f32.xlu0 %v707_v3  ;;  %v704_v4 = vsel %vm303_vm3, %v696_v2, -inf }
 0x5cd   :  { %705 = vmax.xlane.f32.xlu1 %v704_v4  ;;  %v75_v4 = vld [vmem:[#allocation5 + $0x38] sm:$0xff] }
 0x5de   :  { %1750 = vrot.lane.b32.xlu1 %v2020_v41, %s1918_s29 }
 0x5e2   :  { %813 = vrot.lane.b32.xlu1 %v2014_v40, %s1919_s30 }
 0x5e6   :  { %815 = vrot.lane.b32.xlu1 %v2012_v38, %s1919_s30 }
 0x659   :  { %v709_v5 = vpop.xlane.xlu0 %708 }
 0x65a   :  { %v711_v6 = vsub.f32 %v701_v62, %v709_v5  ;;  %v706_v7 = vpop.xlane.xlu1 %705  ;;  %v72_v62 = vld [vmem:[#allocation5 + $0x20] sm:$0xff] }
 0x65b   :  { %v710_v8 = vsub.f32 %v696_v2, %v706_v7  ;;  %v74_v2 = vld [vmem:[#allocation5 + $0x30] sm:$0xff]  ;;  %v1672_v3 = vpack.c.bf16 %v73_v63, %v72_v62  ;;  %v83_v63 = vld [vmem:[#allocation5 + $0x78] sm:$0xff] }
 0x65c   :  { %v714_v9 = vmul.f32 1.442695, %v711_v6  ;;  %v1676_v5 = vpack.c.bf16 %v75_v4, %v74_v2  ;;  %v82_v62 = vld [vmem:[#allocation5 + $0x70] sm:$0xff]  ;;  %v85_v4 = vld [vmem:[#allocation5 + $0x88] sm:$0xff] }
 0x65d   :  { %v712_v10 = vmul.f32 1.442695, %v710_v8  ;;  %v1692_v2 = vpack.c.bf16 %v83_v63, %v82_v62 }
 0x65e   :  { %1784 = vpow2.f32 %v714_v9  ;;  %v1751_v11 = vpop.permute.xlu1 %1750 }
 0x65f   :  { %v1753_v12 = vunpack.i.h.bf16 %v1751_v11  ;;  %v1752_v13 = vunpack.i.l.bf16 %v1751_v11  ;;  %1786 = vpow2.f32 %v712_v10 }
 0x661   :  { %v1658_v14 = vpack.c.bf16 %v1753_v12, %v1752_v13 }
 0x662   :  { %v814_v27 = vpop.permute.xlu1 %813 }
 0x663   :  { %1659 = vmatprep.subr.bf16.mxu1 %v1658_v14 }
 0x664   :  { %1661 = vmatpush3.bf16.msra.mxu1 %v1658_v14 }
 0x666   :  { %v816_v28 = vpop.permute.xlu1 %815 }
 0x668   :  { %v1785_v15 = vpop.eup %1784 }
 0x669   :  { %v719_v16 = vsel %vm303_vm3, %v1785_v15, 0.0  ;;  %v1787_v40 = vpop.eup %1786 }
 0x66a   :  { %720 = vadd.xlane.f32.xlu0 %v719_v16  ;;  %v716_v38 = vsel %vm303_vm3, %v1787_v40, 0.0 }
 0x66e   :  { %717 = vadd.xlane.f32.xlu0 %v716_v38 }
 0x684   :  { %1755 = vrot.lane.b32.xlu0 %v2020_v41, %s1920_s4 }
 0x6f7   :  { %v721_v17 = vpop.xlane.xlu0 %720 }
 0x6f8   :  { %1788 = vrcp.f32 %v721_v17  ;;  %v1445_v17 = vld [vmem:[#allocation7 + $0x3] ss:$0 sm:$0xff] }
 0x6fb   :  { %v718_v18 = vpop.xlane.xlu0 %717 }
 0x6fc   :  { %1790 = vrcp.f32 %v718_v18 }
 0x6ff   :  { %v1756_v19 = vpop.permute.xlu0 %1755 }
 0x700   :  { %v1758_v20 = vunpack.i.h.bf16 %v1756_v19  ;;  %v1757_v21 = vunpack.i.l.bf16 %v1756_v19 }
 0x702   :  { %v1662_v22 = vpack.c.bf16 %v1758_v20, %v1757_v21  ;;  %v1789_v23 = vpop.eup %1788 }
 0x703   :  { %v725_v26 = vmul.f32 %v1789_v23, %v1785_v15 }
 0x704   :  { %1664 = vmatprep.subr.msk.bf16.mxu1 %vm2028_vm2, %v1662_v22 }
 0x706   :  { %v1791_v24 = vpop.eup %1790 }
 0x707   :  { %v723_v25 = vmul.f32 %v1791_v24, %v1787_v40 }
 0x709   :  { %1566 = vmatprep.mubr.msk.f32.mxu1 %vm303_vm3, %v723_v25 }
 0x70a   :  { %1567 = vmatmul.mubr.msk.f32.vlgmr.msra.gmra.mrb[6].mxu1 %vm303_vm3, %v725_v26 }
 0x70b   :  { %1667 = vmatpush3.bf16.xpose.msk.msra.mxu1 %vm2028_vm2, %v1662_v22  ;;  %1573 = vmatprep.mubr.msk.f32.mxu1 %vm219_vm1, %v814_v27 }
 0x712   :  { %1574 = vmatmul.mubr.msk.f32.vlgmr.msra.gmra.mrb[8].mxu1 %vm219_vm1, %v816_v28 }
 0x7dd   :  { %v1568_v29 = vpop.f32.mrb[6].mxu1 }
 0x7de   :  { %v804_v30 = vpop.f32.mrb[7].mxu1 }
 0x7e5   :  { %v1575_v31 = vpop.f32.mrb[8].mxu1 }
 0x7e6   :  { %v901_v32 = vadd.f32 %v1575_v31, %v2044_v53  ;;  %v895_v33 = vpop.f32.mrb[9].mxu1 }
 0x7e7   :  { %v896_v34 = vadd.f32 %v895_v33, %v2046_v54  ;;  %v77_v33 = vld [vmem:[#allocation5 + $0x48] sm:$0xff] }
 0x7e8   :  { %v907_v35 = vsel %vm303_vm3, %v901_v32, -inf }
 0x7e9   :  { %908 = vmax.xlane.f32.xlu0 %v907_v35  ;;  %v904_v36 = vsel %vm303_vm3, %v896_v34, -inf  ;;  %v78_v35 = vld [vmem:[#allocation5 + $0x50] sm:$0xff] }
 0x7ea   :  { %905 = vmax.xlane.f32.xlu1 %v904_v36  ;;  %v79_v36 = vld [vmem:[#allocation5 + $0x58] sm:$0xff] }
 0x7fb   :  { %1760 = vrot.lane.b32.xlu1 %v2020_v41, %s1921_s5 }
 0x7ff   :  { %1017 = vrot.lane.b32.xlu1 %v2079_v59, %s1909_s25 }
 0x803   :  { %1023 = vrot.lane.b32.xlu1 %v804_v30, %s1922_s6 }
 0x807   :  { %1025 = vrot.lane.b32.xlu1 %v1568_v29, %s1922_s6 }
 0x876   :  { %v909_v48 = vpop.xlane.xlu0 %908 }
 0x877   :  { %v911_v53 = vsub.f32 %v901_v32, %v909_v48  ;;  %v906_v37 = vpop.xlane.xlu1 %905  ;;  %v76_v32 = vld [vmem:[#allocation5 + $0x40] sm:$0xff]  ;;  %v1684_v48 = vpack.c.bf16 %v79_v36, %v78_v35 }
 0x878   :  { %v910_v39 = vsub.f32 %v896_v34, %v906_v37  ;;  %v1680_v34 = vpack.c.bf16 %v77_v33, %v76_v32 }
 0x879   :  { %v914_v54 = vmul.f32 1.442695, %v911_v53 }
 0x87a   :  { %v912_v42 = vmul.f32 1.442695, %v910_v39  ;;  %1681 = vmatprep.subr.bf16.mxu1 %v1680_v34 }
 0x87b   :  { %v1761_v43 = vpop.permute.xlu1 %1760  ;;  %1683 = vmatpush3.bf16.msra.mxu1 %v1680_v34 }
 0x87c   :  { %1792 = vpow2.f32 %v912_v42  ;;  %v1763_v44 = vunpack.i.h.bf16 %v1761_v43  ;;  %v1762_v45 = vunpack.i.l.bf16 %v1761_v43  ;;  %1685 = vmatprep.subr.bf16.mxu1 %v1684_v48 }
 0x87d   :  { %1794 = vpow2.f32 %v914_v54 }
 0x87e   :  { %v1668_v46 = vpack.c.bf16 %v1763_v44, %v1762_v45  ;;  %v1448_v45 = vld [vmem:[#allocation7 + $0x4] ss:$0 sm:$0xff] }
 0x87f   :  { %v1018_v7 = vpop.permute.xlu1 %1017  ;;  %1687 = vmatpush3.bf16.msra.mxu1 %v1684_v48 }
 0x880   :  { %1669 = vmatprep.subr.bf16.mxu0 %v1668_v46  ;;  %v1038_v13 = vsel %vm219_vm1, %v2075_v57, %v1018_v7 }
 0x881   :  { %1671 = vmatpush3.bf16.msra.mxu0 %v1668_v46 }
 0x882   :  { %1673 = vmatprep.subr.bf16.mxu0 %v1672_v3 }
 0x883   :  { %v1024_v8 = vpop.permute.xlu1 %1023 }
 0x886   :  { %v1793_v41 = vpop.eup %1792 }
 0x887   :  { %v916_v47 = vsel %vm303_vm3, %v1793_v41, 0.0  ;;  %v1795_v49 = vpop.eup %1794  ;;  %v1026_v10 = vpop.permute.xlu1 %1025 }
 0x888   :  { %917 = vadd.xlane.f32.xlu0 %v916_v47  ;;  %v919_v50 = vsel %vm303_vm3, %v1795_v49, 0.0  ;;  %v1040_v16 = vsel %vm303_vm3, %v1038_v13, %v1026_v10 }
 0x88c   :  { %920 = vadd.xlane.f32.xlu0 %v919_v50 }
 0x8a2   :  { %1015 = vrot.lane.b32.xlu0 %v2081_v60, %s1909_s25 }
 0x915   :  { %v918_v51 = vpop.xlane.xlu0 %917 }
 0x916   :  { %1796 = vrcp.f32 %v918_v51 }
 0x919   :  { %v921_v52 = vpop.xlane.xlu0 %920 }
 0x91a   :  { %1798 = vrcp.f32 %v921_v52 }
 0x91d   :  { %v1016_v9 = vpop.permute.xlu0 %1015 }
 0x91e   :  { %v1037_v11 = vsel %vm219_vm1, %v2077_v58, %v1016_v9 }
 0x91f   :  { %v1039_v14 = vsel %vm303_vm3, %v1037_v11, %v1024_v8  ;;  %v1450_v8 = vld [vmem:[#allocation7 + $0x6] ss:$0 sm:$0xff] }
 0x920   :  { %v1797_v55 = vpop.eup %1796 }
 0x921   :  { %v923_v56 = vmul.f32 %v1797_v55, %v1793_v41  ;;  %v1449_v41 = vld [vmem:[#allocation7 + $0x5] ss:$0 sm:$0xff] }
 0x923   :  { %1580 = vmatprep.mubr.msk.f32.mxu0 %vm303_vm3, %v923_v56  ;;  %v80_v56 = vld [vmem:[#allocation5 + $0x60] sm:$0xff] }
 0x924   :  { %v1799_v59 = vpop.eup %1798 }
 0x925   :  { %v925_v61 = vmul.f32 %v1799_v59, %v1795_v49  ;;  %v81_v59 = vld [vmem:[#allocation5 + $0x68] sm:$0xff] }
 0x927   :  { %1581 = vmatmul.mubr.msk.f32.vlgmr.msra.gmra.mrb[6].mxu0 %vm303_vm3, %v925_v61  ;;  %v1688_v61 = vpack.c.bf16 %v81_v59, %v80_v56 }
 0x928   :  { %1675 = vmatpush3.bf16.msra.mxu0 %v1672_v3  ;;  %v84_v3 = vld [vmem:[#allocation5 + $0x80] sm:$0xff] }
 0x929   :  { %1677 = vmatprep.subr.bf16.mxu0 %v1676_v5 }
 0x92c   :  { %1679 = vmatpush3.bf16.msra.mxu0 %v1676_v5  ;;  %v1696_v5 = vpack.c.bf16 %v85_v4, %v84_v3  ;;  %v1453_v3 = vld [vmem:[#allocation7 + $0x7] ss:$0 sm:$0xff] }
 0x92d   :  { %1689 = vmatprep.subr.bf16.mxu0 %v1688_v61 }
 0x9fa   :  { %v1582_v60 = vpop.f32.mrb[6].mxu0 }
 0x9fb   :  { %1033 = vrot.lane.b32.xlu1 %v1582_v60, %s1923_s7  ;;  %v1004_v6 = vpop.f32.mrb[7].mxu0  ;;  %v86_v60 = vld [vmem:[#allocation5 + $0x90] sm:$0xff] }
 0x9fc   :  { %1031 = vrot.lane.b32.xlu0 %v1004_v6, %s1923_s7  ;;  %v87_v6 = vld [vmem:[#allocation5 + $0x98] sm:$0xff] }
 0x9fd   :  { %v1700_v7 = vpack.c.bf16 %v87_v6, %v86_v60 }
 0xa6d   :  { %v1034_v12 = vpop.permute.xlu1 %1033 }
 0xa6e   :  { %v1032_v15 = vpop.permute.xlu0 %1031  ;;  %v1043_v38 = vsel %vm1041_vm4, %v1040_v16, %v1034_v12 }
 0xa6f   :  { %v1042_v40 = vsel %vm1041_vm4, %v1039_v14, %v1032_v15 }
 0xa70   :  { %1591 = vmatprep.mubr.msk.f32.mxu0 %vm88_vm0, %v1042_v40 }
 0xa71   :  { %1592 = vmatmul.mubr.msk.f32.vlgmr.msra.gmra.mrb[8].mxu0 %vm88_vm0, %v1043_v38 }
 0xa72   :  { %1691 = vmatpush3.bf16.msra.mxu0 %v1688_v61 }
 0xa73   :  { %1693 = vmatprep.subr.bf16.mxu0 %v1692_v2 }
 0xa76   :  { %1695 = vmatpush3.bf16.msra.mxu0 %v1692_v2 }
 0xa77   :  { %1697 = vmatprep.subr.bf16.mxu0 %v1696_v5 }
 0xa7a   :  { %1699 = vmatpush3.bf16.msra.mxu0 %v1696_v5 }
 0xa7b   :  { %1701 = vmatprep.subr.bf16.mxu0 %v1700_v7 }
 0xa7e   :  { %1703 = vmatpush3.bf16.msra.mxu0 %v1700_v7 }
 0xb44   :  { %v1593_v18 = vpop.f32.mrb[8].mxu0 }
 0xb45   :  { %v1126_v19 = vadd.f32 %v1593_v18, %v1445_v17  ;;  %v1120_v58 = vpop.f32.mrb[9].mxu0 }
 0xb46   :  { %v1121_v20 = vadd.f32 %v1445_v17, %v1120_v58 }
 0xb47   :  { %v2123_v21 = vadd.f32 %v1126_v19, %v2000_v1 }
 0xb48   :  { %v2126_v57 = vadd.f32 %v1121_v20, %v1998_v0 }
 0xb49   :  { %v1134_v22 = vsel %vm88_vm0, %v2123_v21, 0.0 }
 0xb4a   :  { %1135 = vadd.xlane.f32.xlu1 %v1134_v22  ;;  %v1131_v23 = vsel %vm88_vm0, %v2126_v57, 0.0 }
 0xb4b   :  { %1132 = vadd.xlane.f32.xlu0 %v1131_v23 }
 0xbd7   :  { %v1136_v24 = vpop.xlane.xlu1 %1135 }
 0xbd8   :  { %v1138_v25 = vmul.f32 0.03125, %v1136_v24  ;;  %v1133_v26 = vpop.xlane.xlu0 %1132 }
 0xbd9   :  { %v1137_v27 = vmul.f32 0.03125, %v1133_v26 }
 0xbda   :  { %v1140_v28 = vsub.f32 %v2123_v21, %v1138_v25 }
 0xbdb   :  { %v1139_v1 = vsub.f32 %v2126_v57, %v1137_v27 }
 0xbdc   :  { %v1142_v30 = vmul.f32 %v1140_v28, %v1140_v28 }
 0xbdd   :  { %v1141_v29 = vmul.f32 %v1139_v1, %v1139_v1 }
 0xbde   :  { %v1146_v31 = vsel %vm88_vm0, %v1142_v30, 0.0 }
 0xbdf   :  { %v1143_v0 = vsel %vm88_vm0, %v1141_v29, 0.0 }
 0xbe0   :  { %1144 = vadd.xlane.f32.xlu0 %v1143_v0 }
 0xbe4   :  { %1147 = vadd.xlane.f32.xlu0 %v1146_v31 }
 0xc6d   :  { %v1145_v53 = vpop.xlane.xlu0 %1144 }
 0xc6e   :  { %v1149_v37 = vmul.f32 0.03125, %v1145_v53 }
 0xc70   :  { %v1151_v39 = vadd.f32 1e-06, %v1149_v37 }
 0xc71   :  { %v1148_v54 = vpop.xlane.xlu0 %1147 }
 0xc72   :  { %1800 = vrsqrt.f32 %v1151_v39  ;;  %v1150_v42 = vmul.f32 0.03125, %v1148_v54 }
 0xc74   :  { %v1152_v43 = vadd.f32 1e-06, %v1150_v42 }
 0xc76   :  { %1802 = vrsqrt.f32 %v1152_v43 }
 0xc7c   :  { %v1801_v44 = vpop.eup %1800 }
 0xc7d   :  { %v1155_v46 = vmul.f32 %v1801_v44, %v1139_v1 }
 0xc7f   :  { %v1161_v47 = vmul.f32 %v1448_v45, %v1155_v46 }
 0xc80   :  { %v1803_v49 = vpop.eup %1802 }
 0xc81   :  { %v1156_v50 = vmul.f32 %v1803_v49, %v1140_v28  ;;  %v1167_v51 = vadd.f32 %v1449_v41, %v1161_v47  ;;  %v1924_v47 = vmov 1.0  }
 0xc83   :  { %v1162_v52 = vmul.f32 %v1448_v45, %v1156_v50  ;;  %1602 = vmatprep.mubr.msk.f32.mxu1 %vm88_vm0, %v1167_v51 }
 0xc85   :  { %v1168_v55 = vadd.f32 %v1449_v41, %v1162_v52 }
 0xc87   :  { %1603 = vmatmul.mubr.msk.f32.vlgmr.msra.gmra.mrb[10].mxu1 %vm88_vm0, %v1168_v55 }
 0xd5a   :  { %v1604_v9 = vpop.f32.mrb[10].mxu1 }
 0xd5b   :  { %v1251_v10 = vadd.f32 %v1604_v9, %v1450_v8  ;;  %v1245_v11 = vpop.f32.mrb[11].mxu1 }
 0xd5c   :  { %v1246_v12 = vadd.f32 %v1450_v8, %v1245_v11 }
 0xd5d   :  { %v1257_v13 = vmul.f32 0.70710677, %v1251_v10  ;;  %v1255_v62 = vmul.f32 0.5, %v1251_v10 }
 0xd5e   :  { %v1256_v14 = vmul.f32 0.70710677, %v1246_v12  ;;  %v1254_v59 = vmul.f32 0.5, %v1246_v12 }
 0xd5f   :  { %v1263_v15 = vand.u32 2147483647, %v1257_v13  ;;  %vm1259_vm5 = vcmp.lt.f32.partialorder %v1257_v13, 0.0 }
 0xd60   :  { %v1262_v16 = vand.u32 2147483647, %v1256_v14  ;;  %vm1258_vm6 = vcmp.lt.f32.partialorder %v1256_v14, 0.0  ;;  %v1261_v49 = vsel %vm1259_vm5, -1.0, %v1924_v47 }
 0xd61   :  { %v1265_v40 = vmul.f32 0.3275911, %v1263_v15  ;;  %v1291_v19 = vsub.f32 0.0, %v1263_v15  ;;  %v1260_v52 = vsel %vm1258_vm6, -1.0, %v1924_v47 }
 0xd62   :  { %v1264_v38 = vmul.f32 0.3275911, %v1262_v16  ;;  %v1290_v58 = vsub.f32 0.0, %v1262_v16 }
 0xd63   :  { %v1267_v17 = vadd.f32 1.0, %v1265_v40  ;;  %v1293_v22 = vmul.f32 %v1291_v19, %v1263_v15 }
 0xd64   :  { %v1266_v18 = vadd.f32 1.0, %v1264_v38  ;;  %v1292_v25 = vmul.f32 %v1290_v58, %v1262_v16 }
 0xd65   :  { %1804 = vrcp.f32 %v1267_v17  ;;  %v1296_v28 = vmul.f32 1.442695, %v1293_v22 }
 0xd66   :  { %1806 = vrcp.f32 %v1266_v18  ;;  %v1294_v0 = vmul.f32 1.442695, %v1292_v25 }
 0xd67   :  { %1808 = vpow2.f32 %v1296_v28 }
 0xd68   :  { %1810 = vpow2.f32 %v1294_v0 }
 0xd6f   :  { %v1805_v20 = vpop.eup %1804 }
 0xd70   :  { %v1807_v23 = vpop.eup %1806  ;;  %v1273_v24 = vmul.f32 1.0614054, %v1805_v20 }
 0xd71   :  { %v1272_v26 = vmul.f32 1.0614054, %v1807_v23  ;;  %v1809_v42 = vpop.eup %1808 }
 0xd72   :  { %v1275_v27 = vadd.f32 -1.4531521, %v1273_v24  ;;  %v1811_v44 = vpop.eup %1810 }
 0xd73   :  { %v1274_v1 = vadd.f32 -1.4531521, %v1272_v26 }
 0xd74   :  { %v1277_v29 = vmul.f32 %v1805_v20, %v1275_v27 }
 0xd75   :  { %v1276_v30 = vmul.f32 %v1807_v23, %v1274_v1 }
 0xd76   :  { %v1279_v31 = vadd.f32 1.4214138, %v1277_v29 }
 0xd77   :  { %v1278_v32 = vadd.f32 1.4214138, %v1276_v30 }
 0xd78   :  { %v1281_v33 = vmul.f32 %v1805_v20, %v1279_v31 }
 0xd79   :  { %v1280_v34 = vmul.f32 %v1807_v23, %v1278_v32 }
 0xd7a   :  { %v1283_v35 = vadd.f32 -0.28449672, %v1281_v33 }
 0xd7b   :  { %v1282_v36 = vadd.f32 -0.28449672, %v1280_v34 }
 0xd7c   :  { %v1285_v48 = vmul.f32 %v1805_v20, %v1283_v35 }
 0xd7d   :  { %v1284_v53 = vmul.f32 %v1807_v23, %v1282_v36 }
 0xd7e   :  { %v1287_v37 = vadd.f32 0.2548296, %v1285_v48 }
 0xd7f   :  { %v1286_v39 = vadd.f32 0.2548296, %v1284_v53 }
 0xd80   :  { %v1289_v54 = vmul.f32 %v1805_v20, %v1287_v37 }
 0xd81   :  { %v1288_v43 = vmul.f32 %v1807_v23, %v1286_v39 }
 0xd82   :  { %v1299_v45 = vmul.f32 %v1809_v42, %v1289_v54 }
 0xd83   :  { %v1298_v46 = vmul.f32 %v1811_v44, %v1288_v43 }
 0xd84   :  { %v1301_v41 = vsub.f32 1.0, %v1299_v45 }
 0xd85   :  { %v1300_v50 = vsub.f32 1.0, %v1298_v46 }
 0xd86   :  { %v1303_v51 = vmul.f32 %v1301_v41, %v1261_v49 }
 0xd87   :  { %v1302_v55 = vmul.f32 %v1300_v50, %v1260_v52 }
 0xd88   :  { %v1305_v56 = vadd.f32 1.0, %v1303_v51 }
 0xd89   :  { %v1304_v61 = vadd.f32 1.0, %v1302_v55 }
 0xd8a   :  { %v1307_v2 = vmul.f32 %v1305_v56, %v1255_v62 }
 0xd8b   :  { %v1306_v63 = vmul.f32 %v1304_v61, %v1254_v59 }
 0xd8d   :  { %1621 = vmatprep.mubr.msk.f32.mxu0 %vm1312_vm7, %v1306_v63 }
 0xd8e   :  { %1622 = vmatmul.mubr.msk.f32.vlgmr.msra.gmra.mrb[10].mxu0 %vm1312_vm7, %v1307_v2 }
 0xe61   :  { %v1623_v4 = vpop.f32.mrb[10].mxu0 }
 0xe62   :  { %v1391_v5 = vadd.f32 %v1623_v4, %v1453_v3  ;;  %v1385_v60 = vpop.f32.mrb[11].mxu0 }
 0xe63   :  { %v1386_v6 = vadd.f32 %v1453_v3, %v1385_v60 }
 0xe64   :  { %v1395_v7 = vadd.f32 %v1391_v5, %v2123_v21 }
 0xe65   :  { %v1394_v8 = vadd.f32 %v1386_v6, %v2126_v57 }
 0xe66   :  { %1397 = vst.msk [vmem:[#allocation8 + $0x8] sm:$0xff] %vm88_vm0, %v1395_v7 }
 0xe67   :  { %1396 = vst.msk [vmem:[#allocation8] sm:$0xff] %vm88_vm0, %v1394_v8 }
 0xe68   :  { %1889 = shalt.err (!%p1886_p0)
}
 0xe69   :  { %s1890_s12 = scalar_lea.hbm %s2160_s3, 256 }
 0xe6a   :  { %p1891_p1 = scmp.ne.s32.totalorder %s2160_s3, %s1890_s12  ;;  %p1894_p2 = scmp.lt.u32.totalorder %s1890_s12, %s2160_s3 }
 0xe6c   :  { %p1896_p3 = pnand %p1894_p2, %p1891_p1 }
 0xe6e   :  { %1899 = shalt.err (!%p1896_p3)
}
 0xe6f   :  { %1409 = dma.vmem_to_hbm [thread:$0]  %s1404_s1, 256, %s2160_s3, [#allocation4], %s1908_s24, %s1908_s24, %s1909_s25  }
 0xe70   :  { %1904 = dma.done.wait [#allocation4], 256  }
 0xe71   :  { %1905 = vsyncadd [#allocation4], 4294967040 }
 0xe72   :  { %1413 = vsyncpa [#allocation3], 1 }
 0xe73   :  { %1414 = vsyncpa [#allocation6], 1 }
 0xe74   :  { %1415 = vsyncpa [#allocation4], 1 }

</bundles_post_ra>
